<compile_context>
chip_gen: v6e
topology: v6e:2x2x1
jax: 0.10.0
libtpu: 0.0.40
codegen_flags: <defaults>
</compile_context>

<pallas_src>
import functools

import jax
import jax.numpy as jnp
from jax.experimental import pallas as pl
from jax.experimental.pallas import tpu as pltpu

LANES = 128
SUBLANES = 8
MAX_TILE_ROWS = 2048  # 1 MiB f32 per input block; 4 MiB double-buffered total


def _combo_partials_kernel(p_ref, t_ref, out_ref, *, tile_rows, n_true,
                           needs_mask):
    """Per-block partial sums, kept vreg-shaped (8,128) to stay on the VPU.

    out_ref block (1, 24, 128) f32:
      rows  0: 8  -> per-lane partial sums of BCE elements
      rows  8:16  -> per-lane partial sums of p * t   (dice intersection)
      rows 16:24  -> per-lane partial sums of p + t   (dice denominator)
    """
    i = pl.program_id(0)
    nb = pl.num_programs(0)

    def fold(x):
        # (tile_rows, 128) -> (tile_rows//8, 8, 128); summing over axis 0 is
        # pure vreg-wise VPU adds (no cross-lane XLU work in the hot loop).
        return jnp.sum(x.reshape(tile_rows // SUBLANES, SUBLANES, LANES),
                       axis=0)

    def store(bce, inter, denom):
        out_ref[0, 0:SUBLANES, :] = fold(bce)
        out_ref[0, SUBLANES:2 * SUBLANES, :] = fold(inter)
        out_ref[0, 2 * SUBLANES:3 * SUBLANES, :] = fold(denom)

    def hot_path():
        p = p_ref[...].astype(jnp.float32)
        t = t_ref[...].astype(jnp.float32)
        # PyTorch nn.BCELoss clamps the log terms at -100.
        log_p = jnp.maximum(jnp.log(p), -100.0)
        log_1mp = jnp.maximum(jnp.log(1.0 - p), -100.0)
        bce = -(t * log_p + (1.0 - t) * log_1mp)
        store(bce, p * t, p + t)

    if not needs_mask:
        # Exactly tiled, no padding anywhere: single straight-line path.
        hot_path()
    else:
        # Only the FINAL block can contain padded / out-of-bounds elements;
        # every other block runs the bare hot path (pl.when gating means the
        # mask work is paid once, not per block).
        @pl.when(i != nb - 1)
        def _():
            hot_path()

        @pl.when(i == nb - 1)
        def _():
            p = p_ref[...].astype(jnp.float32)
            t = t_ref[...].astype(jnp.float32)
            base = i * (tile_rows * LANES)
            row_ids = jax.lax.broadcasted_iota(jnp.int32, (tile_rows, LANES), 0)
            lane_ids = jax.lax.broadcasted_iota(jnp.int32, (tile_rows, LANES), 1)
            valid = (base + row_ids * LANES + lane_ids) < n_true
            vf = valid.astype(jnp.float32)
            # where (not multiply) so garbage/NaN in the padded region of a
            # partial block cannot poison the sums, and logs stay finite.
            p_safe = jnp.where(valid, p, 0.5)
            p_z = jnp.where(valid, p, 0.0)
            t_z = jnp.where(valid, t, 0.0)
            log_p = jnp.maximum(jnp.log(p_safe), -100.0)
            log_1mp = jnp.maximum(jnp.log(1.0 - p_safe), -100.0)
            bce = -(t_z * log_p + (1.0 - t_z) * log_1mp) * vf
            store(bce, p_z * t_z, p_z + t_z)


def _pick_tile_rows(rows):
    """rows >= SUBLANES. Large, sublane-multiple tile; >= 2 blocks if possible."""
    if rows < 2 * SUBLANES:
        return SUBLANES
    # Aim for >= 2 grid blocks so the "parallel" axis can split across the
    # two TensorCores on v7x, capped at MAX_TILE_ROWS for VMEM headroom.
    half = pl.cdiv(rows, 2)
    half = pl.cdiv(half, SUBLANES) * SUBLANES
    return min(MAX_TILE_ROWS, half)


def _finalize(bce_sum, inter_sum, denom_sum, n_true, alpha, gamma, smooth):
    bce = bce_sum / jnp.float32(n_true)
    dice = (2.0 * inter_sum + smooth) / (denom_sum + smooth)
    pt = jnp.exp(-bce)
    focal = alpha * (1.0 - pt) ** gamma * bce
    return bce + focal + dice


def _sums_jax(p, t):
    log_p = jnp.maximum(jnp.log(p), -100.0)
    log_1mp = jnp.maximum(jnp.log(1.0 - p), -100.0)
    bce = jnp.sum(-(t * log_p + (1.0 - t) * log_1mp))
    return bce, jnp.sum(p * t), jnp.sum(p) + jnp.sum(t)


def combo_loss_pallas(predicted, target, alpha=0.5, gamma=0.5, smooth=1e-6):
    """ComboLoss forward: BCE(mean) + FocalLoss + Dice-coefficient term.

    `predicted` / `target` may be any float/int dtype (bf16 / int8 targets
    are fine); accumulation is f32 in-kernel.
    """
    p_flat = jnp.reshape(predicted, (-1,))          # keep native dtype
    t_flat = jnp.reshape(target, (-1,))
    n_true = int(p_flat.shape[0])

    # Tiny inputs: not worth a kernel launch (and the sublane dim can't tile).
    if n_true < SUBLANES * LANES:
        b, i, d = _sums_jax(p_flat.astype(jnp.float32),
                            t_flat.astype(jnp.float32))
        return _finalize(b, i, d, n_true, alpha, gamma, smooth)

    # Lane alignment only: pad by < 128 elements when the flat size is ragged.
    # The common aligned case (n % 128 == 0) is a pure bitcast reshape.
    n_pad = pl.cdiv(n_true, LANES) * LANES
    if n_pad != n_true:
        p_flat = jnp.pad(p_flat, (0, n_pad - n_true))
        t_flat = jnp.pad(t_flat, (0, n_pad - n_true))

    rows = n_pad // LANES
    p2d = p_flat.reshape(rows, LANES)
    t2d = t_flat.reshape(rows, LANES)

    tile_rows = _pick_tile_rows(rows)
    num_blocks = pl.cdiv(rows, tile_rows)
    needs_mask = (n_pad != n_true) or (rows % tile_rows != 0)

    kernel = functools.partial(
        _combo_partials_kernel,
        tile_rows=int(tile_rows),
        n_true=n_true,
        needs_mask=bool(needs_mask),
    )

    partials = pl.pallas_call(
        kernel,
        out_shape=jax.ShapeDtypeStruct(
            (num_blocks, 3 * SUBLANES, LANES), jnp.float32),
        grid_spec=pltpu.PrefetchScalarGridSpec(
            num_scalar_prefetch=0,
            grid=(num_blocks,),
            in_specs=[
                pl.BlockSpec((tile_rows, LANES), lambda i: (i, 0)),
                pl.BlockSpec((tile_rows, LANES), lambda i: (i, 0)),
            ],
            out_specs=pl.BlockSpec((1, 3 * SUBLANES, LANES),
                                   lambda i: (i, 0, 0)),
        ),
        compiler_params=pltpu.CompilerParams(
            dimension_semantics=("parallel",),
        ),
    )(p2d, t2d)

    # Tiny cross-block reduce + scalar finalize in plain JAX.
    sums = jnp.sum(partials.reshape(num_blocks, 3, SUBLANES, LANES),
                   axis=(0, 2, 3))
    return _finalize(sums[0], sums[1], sums[2], n_true, alpha, gamma, smooth)


def combo_loss_ref(predicted, target, alpha=0.5, gamma=0.5, smooth=1e-6):
    """Pure-JAX reference mirroring the PyTorch module."""
    p = jnp.reshape(predicted, (-1,)).astype(jnp.float32)
    t = jnp.reshape(target, (-1,)).astype(jnp.float32)
    log_p = jnp.maximum(jnp.log(p), -100.0)
    log_1mp = jnp.maximum(jnp.log(1.0 - p), -100.0)
    bce = jnp.mean(-(t * log_p + (1.0 - t) * log_1mp))
    dice = (2.0 * jnp.sum(p * t) + smooth) / (jnp.sum(p) + jnp.sum(t) + smooth)
    pt = jnp.exp(-bce)
    focal = alpha * (1.0 - pt) ** gamma * bce
    return bce + focal + dice


if __name__ == "__main__":
    key = jax.random.PRNGKey(0)
    k1, k2, k3, k4 = jax.random.split(key, 4)

    # Case 1: lane-aligned NCHW (batch=2, channels=4, 16x16) -> 2048 elements,
    # two full (8,128) blocks, unmasked hot path, both TC-parallel blocks.
    logits = jax.random.normal(k1, (2, 4, 16, 16), dtype=jnp.float32)
    predicted = jax.nn.sigmoid(logits)
    target = jax.random.bernoulli(k2, 0.5, (2, 4, 16, 16)).astype(jnp.float32)

    loss = combo_loss_pallas(predicted, target)
    loss = jax.block_until_ready(loss)
    ref = combo_loss_ref(predicted, target)
    assert jnp.allclose(loss, ref, rtol=1e-5, atol=1e-5), (loss, ref)

    # Case 2: ragged size (2*4*17*19 = 2584, not a multiple of 128) with a
    # narrow (bf16) target -> exercises the pl.when-gated last-block mask and
    # the in-kernel dtype cast.
    logits2 = jax.random.normal(k3, (2, 4, 17, 19), dtype=jnp.float32)
    predicted2 = jax.nn.sigmoid(logits2)
    target2 = jax.random.bernoulli(k4, 0.5, (2, 4, 17, 19)).astype(jnp.bfloat16)

    loss2 = combo_loss_pallas(predicted2, target2)
    loss2 = jax.block_until_ready(loss2)
    ref2 = combo_loss_ref(predicted2, target2)
    assert jnp.allclose(loss2, ref2, rtol=1e-5, atol=1e-5), (loss2, ref2)

    print("KERNEL_OK")
</pallas_src>

<mosaic_0001>
module attributes {stable_mosaic.version = 11 : i64} {
  func.func @_combo_partials_kernel(%arg0: i32, %arg1: memref<8x128xf32, #tpu.memory_space<vmem>>, %arg2: memref<8x128xf32, #tpu.memory_space<vmem>>, %arg3: memref<1x24x128xf32, #tpu.memory_space<vmem>>) attributes {dimension_semantics = [#tpu.dimension_semantics<parallel>], iteration_bounds = array<i64: 2>, scalar_prefetch = 0 : i64, scratch_operands = 0 : i64, tpu.core_type = #tpu.core_type<tc>, window_params = [{transform_indices = @transform_0, window_bounds = array<i64: 8, 128>}, {transform_indices = @transform_1, window_bounds = array<i64: 8, 128>}, {transform_indices = @transform_2, window_bounds = array<i64: 1, 24, 128>}]} {
    %c0 = arith.constant 0 : index
    %c0_0 = arith.constant 0 : index
    %0 = vector.load %arg1[%c0, %c0_0] : memref<8x128xf32, #tpu.memory_space<vmem>>, vector<8x128xf32>
    %c0_1 = arith.constant 0 : index
    %c0_2 = arith.constant 0 : index
    %1 = vector.load %arg2[%c0_1, %c0_2] : memref<8x128xf32, #tpu.memory_space<vmem>>, vector<8x128xf32>
    %2 = math.log %0 : vector<8x128xf32>
    %cst = arith.constant -1.000000e+02 : f32
    %3 = vector.broadcast %cst : f32 to vector<8x128xf32>
    %4 = arith.maximumf %2, %3 : vector<8x128xf32>
    %cst_3 = arith.constant 1.000000e+00 : f32
    %5 = vector.broadcast %cst_3 : f32 to vector<8x128xf32>
    %6 = arith.subf %5, %0 : vector<8x128xf32>
    %7 = math.log %6 : vector<8x128xf32>
    %cst_4 = arith.constant -1.000000e+02 : f32
    %8 = vector.broadcast %cst_4 : f32 to vector<8x128xf32>
    %9 = arith.maximumf %7, %8 : vector<8x128xf32>
    %10 = arith.mulf %1, %4 : vector<8x128xf32>
    %cst_5 = arith.constant 1.000000e+00 : f32
    %11 = vector.broadcast %cst_5 : f32 to vector<8x128xf32>
    %12 = arith.subf %11, %1 : vector<8x128xf32>
    %13 = arith.mulf %12, %9 : vector<8x128xf32>
    %14 = arith.addf %10, %13 : vector<8x128xf32>
    %cst_6 = arith.constant 0.000000e+00 : f32
    %15 = vector.broadcast %cst_6 : f32 to vector<8x128xf32>
    %16 = arith.subf %15, %14 : vector<8x128xf32>
    %17 = arith.mulf %0, %1 : vector<8x128xf32>
    %18 = arith.addf %0, %1 : vector<8x128xf32>
    %19 = vector.shape_cast %16 : vector<8x128xf32> to vector<1x8x128xf32>
    %cst_7 = arith.constant dense<0.000000e+00> : vector<8x128xf32>
    %20 = vector.multi_reduction <add>, %19, %cst_7 [0] : vector<1x8x128xf32> to vector<8x128xf32>
    %c0_8 = arith.constant 0 : index
    %c0_9 = arith.constant 0 : index
    %c0_10 = arith.constant 0 : index
    %21 = vector.load %arg3[%c0_8, %c0_9, %c0_10] : memref<1x24x128xf32, #tpu.memory_space<vmem>>, vector<1x8x128xf32>
    %22 = vector.shape_cast %21 : vector<1x8x128xf32> to vector<8x128xf32>
    %23 = vector.shape_cast %20 : vector<8x128xf32> to vector<1x8x128xf32>
    tpu.vector_store %arg3[%c0_8, %c0_9, %c0_10], %23 {strides = array<i32>} : memref<1x24x128xf32, #tpu.memory_space<vmem>>, vector<1x8x128xf32>,
    %24 = vector.shape_cast %17 : vector<8x128xf32> to vector<1x8x128xf32>
    %cst_11 = arith.constant dense<0.000000e+00> : vector<8x128xf32>
    %25 = vector.multi_reduction <add>, %24, %cst_11 [0] : vector<1x8x128xf32> to vector<8x128xf32>
    %c0_12 = arith.constant 0 : index
    %c8 = arith.constant 8 : index
    %c0_13 = arith.constant 0 : index
    %26 = vector.load %arg3[%c0_12, %c8, %c0_13] : memref<1x24x128xf32, #tpu.memory_space<vmem>>, vector<1x8x128xf32>
    %27 = vector.shape_cast %26 : vector<1x8x128xf32> to vector<8x128xf32>
    %28 = vector.shape_cast %25 : vector<8x128xf32> to vector<1x8x128xf32>
    tpu.vector_store %arg3[%c0_12, %c8, %c0_13], %28 {strides = array<i32>} : memref<1x24x128xf32, #tpu.memory_space<vmem>>, vector<1x8x128xf32>,
    %29 = vector.shape_cast %18 : vector<8x128xf32> to vector<1x8x128xf32>
    %cst_14 = arith.constant dense<0.000000e+00> : vector<8x128xf32>
    %30 = vector.multi_reduction <add>, %29, %cst_14 [0] : vector<1x8x128xf32> to vector<8x128xf32>
    %c0_15 = arith.constant 0 : index
    %c16 = arith.constant 16 : index
    %c0_16 = arith.constant 0 : index
    %31 = vector.load %arg3[%c0_15, %c16, %c0_16] : memref<1x24x128xf32, #tpu.memory_space<vmem>>, vector<1x8x128xf32>
    %32 = vector.shape_cast %31 : vector<1x8x128xf32> to vector<8x128xf32>
    %33 = vector.shape_cast %30 : vector<8x128xf32> to vector<1x8x128xf32>
    tpu.vector_store %arg3[%c0_15, %c16, %c0_16], %33 {strides = array<i32>} : memref<1x24x128xf32, #tpu.memory_space<vmem>>, vector<1x8x128xf32>,
    return
  }
  func.func @transform_0(%arg0: i32) -> (i32, i32) {
    %c0_i32 = arith.constant 0 : i32
    %c0_i32_0 = arith.constant 0 : i32
    return %arg0, %c0_i32 : i32, i32
  }
  func.func @transform_1(%arg0: i32) -> (i32, i32) {
    %c0_i32 = arith.constant 0 : i32
    %c0_i32_0 = arith.constant 0 : i32
    return %arg0, %c0_i32 : i32, i32
  }
  func.func @transform_2(%arg0: i32) -> (i32, i32, i32) {
    %c0_i32 = arith.constant 0 : i32
    %c0_i32_0 = arith.constant 0 : i32
    %c0_i32_1 = arith.constant 0 : i32
    return %arg0, %c0_i32, %c0_i32_0 : i32, i32, i32
  }
}

</mosaic_0001>

<bundles_post_ra>
// kernel: tpu_custom_call.1
= control target key start
LH: loop header
LB: loop body
LE: loop exit
PB: predicated region body
PF: predicated region fallthrough
CT: control target
= control target key end

     0   :  { %7 = vsyncpa [#allocation3], 0  ;;  %s755_s0 = inlined_call_operand.hbm [shape: f32[16,128], index: 0, kind: input, shape index: {}]   ;;  %s756_s1 = inlined_call_operand.hbm [shape: f32[16,128], index: 1, kind: input, shape index: {}]   ;;  %s757_s2 = inlined_call_operand.hbm [shape: f32[2,24,128], index: 2, kind: output, shape index: {}]  }
   0x1   :  { %9 = vsyncpa [#allocation3 + $0x1], 0 }
   0x2   :  { %10 = vsyncpa [#allocation6], 0 }
   0x3   :  { %12 = vsyncpa [#allocation6 + $0x1], 0 }
   0x4   :  { %13 = vsyncpa [#allocation4], 0 }
   0x5   :  { %15 = vsyncpa [#allocation4 + $0x1], 0  ;;  %s546_s9 = smov 0   ;;  %s548_s10 = smov 0  }
   0x6   :  { %s550_s11 = smov 0   ;;  %s552_s12 = smov 0  }
   0x7 LB: > { %s567_s13 = sadd.s32 4294967295, %s524_s12   ;;  %s328_s14 = sadd.s32 4294967294, %s524_s12   ;;  %s524_s12 = sphi %s552_s12, %s776_s12   ;;  %s520_s11 = sphi %s550_s11, %s775_s11   ;;  %s516_s10 = sphi %s548_s10, %s774_s10   ;;  %s512_s9 = sphi %s546_s9, %s773_s9  }
   0x8   : > { %s571_s15 = sadd.s32 1, %s524_s12   ;;  %s28_s16 = sadd.s32 1, %s520_s11 }
   0x9   : > { %s25_s17 = ssub.s32 %s524_s12, %s571_s15  ;;  %p35_p0 = scmp.ne.s32.totalorder %s520_s11, %s516_s10 }
   0xa   : > { %p26_p1 = scmp.eq.s32.totalorder %s25_s17, 0  ;;  %p36_p2 = scmp.eq.s32.totalorder %s524_s12, 0 }
   0xb   : > { %p41_p3 = scmp.ne.s32.totalorder %s516_s10, %s512_s9  ;;  %p42_p4 = scmp.eq.s32.totalorder %s567_s13, 0 }
   0xc   : > { %s583_s18 = scalar_select %p26_p1, %s520_s11, %s28_s16  }
   0xd   : > { %p585_p5 = por %p36_p2, %p35_p0  ;;  %p589_p6 = por %p42_p4, %p41_p3 }
   0xe   : > { %p91_p7 = scmp.eq.s32.totalorder %s567_s13, 1  ;;  %p97_p8 = scmp.eq.s32.totalorder %s328_s14, 1 }
   0xf   : > { %s761_s20 = scalar_select %p589_p6, 1, 0 }
  0x10   : > { %p360_p10 = scmp.lt.s32.totalorder %s524_s12, 2  ;;  %p596_p11 = por %p91_p7, %p35_p0 }
  0x11   : > { %p600_p12 = por %p97_p8, %p41_p3  ;;  %s605_s23 = sand.u32 1, %s520_s11  }
  0x12   : > { %s762_s21 = scalar_select %p596_p11, 1, 0 }
  0x13   : > { %s763_s22 = scalar_select %p600_p12, 1, 0 }
  0x14   : > { %s332_s24 = sshll.u32 %s524_s12, 7  ;;  %s331_s25 = sshll.u32 %s605_s23, 3 }
  0x15   : > { %s614_s28 = scalar_lea.hbm %s755_s0, %s332_s24  ;;  %s121_s29 = scalar_lea.vmem [#allocation2], %s331_s25 }
  0x16   : > { %s128_s30 = sshll.u32 %s121_s29, 4  ;;  %p620_p13 = pnand %p360_p10, %p585_p5  ;;  %s624_s30 = int_to_ptr.vmem [resolvable:$true] %s128_s30 }
  0x17   : > { %s118_s4 = scalar_lea.sflag [#allocation3], %s605_s23  ;;  %s400_s5 = scalar_lea.hbm %s614_s28, 128 }
  0x18   : > { %p401_p2 = scmp.ne.s32.totalorder %s614_s28, %s400_s5  ;;  %p402_p3 = pneg %p620_p13 }
  0x19   : > { %s405_s8 = scalar_lea.hbm %s755_s0, 256  ;;  %p406_p5 = scmp.lt.s32.totalorder %s614_s28, %s755_s0 }
  0x1a   : > { %p403_p4 = pnand %p402_p3, %p401_p2  ;;  %p407_p8 = scmp.lt.s32.totalorder %s405_s8, %s400_s5 }
  0x1c   : > { %p404_p7 = pneg %p403_p4  ;;  %p408_p10 = por %p407_p8, %p406_p5 }
  0x1e   : > { %p409_p9 = pnand %p408_p10, %p404_p7 }
  0x20   : > { %412 = shalt.err (!%p409_p9)
}
  0x21   : > { %s413_s17 = scalar_lea.vmem %s624_s30, 128  ;;  %s526_s19 = smov [#allocation2]  }
  0x22   : > { %p414_p0 = scmp.ne.s32.totalorder %s624_s30, %s413_s17  ;;  %s418_s26 = sshll.u32 %s526_s19, 4  ;;  %s419_s26 = int_to_ptr.vmem [resolvable:$false] %s418_s26 }
  0x23   : > { %s420_s27 = scalar_lea.vmem %s419_s26, 256  ;;  %p421_p1 = scmp.lt.s32.totalorder %s624_s30, %s419_s26 }
  0x24   : > { %p416_p2 = pnand %p414_p0, %p402_p3  ;;  %p422_p12 = scmp.lt.s32.totalorder %s420_s27, %s413_s17 }
  0x26   : > { %p417_p4 = pneg %p416_p2  ;;  %p423_p11 = por %p422_p12, %p421_p1 }
  0x28   : > { %p424_p5 = pnand %p423_p11, %p417_p4 }
  0x2a   : > { %427 = shalt.err (!%p424_p5)
}
  0x2b   : > { %352 = dma.hbm_to_vmem [thread:$0]  (!%p620_p13), %s614_s28, 128, %s624_s30, %s118_s4  }
  0x2c   : > { %p765_p9 = scmp.lt.s32.totalorder %s524_s12, 3  ;;  %p766_p0 = scmp.ge.s32.totalorder %s524_s12, 1 }
  0x2d   : > { %s666_s7 = scalar_lea.hbm %s756_s1, %s332_s24  ;;  %s139_s8 = scalar_lea.vmem [#allocation5], %s331_s25 }
  0x2e   : > { %p657_p7 = pnand %p766_p0, %p765_p9  ;;  %s146_s14 = sshll.u32 %s139_s8, 4  ;;  %s147_s14 = int_to_ptr.vmem [resolvable:$true] %s146_s14 }
  0x2f   : > { %s136_s28 = scalar_lea.sflag [#allocation6], %s605_s23  ;;  %s428_s30 = scalar_lea.hbm %s666_s7, 128 }
  0x30   : > { %s767_s29 = scalar_select %p657_p7, 1, 0 }
  0x31   : > { %p429_p11 = scmp.ne.s32.totalorder %s666_s7, %s428_s30  ;;  %s433_s17 = scalar_lea.hbm %s756_s1, 256 }
  0x32   : > { %p434_p8 = scmp.lt.s32.totalorder %s666_s7, %s756_s1  ;;  %p435_p10 = scmp.lt.s32.totalorder %s433_s17, %s428_s30 }
  0x33   : > { %p431_p12 = pnand %p429_p11, %p402_p3 }
  0x34   : > { %p436_p2 = por %p435_p10, %p434_p8 }
  0x35   : > { %p432_p1 = pneg %p431_p12 }
  0x37   : > { %p437_p4 = pnand %p436_p2, %p432_p1 }
  0x39   : > { %440 = shalt.err (!%p437_p4)
}
  0x3a   : > { %s441_s25 = scalar_lea.vmem %s147_s14, 128  ;;  %s527_s23 = smov [#allocation5]  }
  0x3b   : > { %p442_p5 = scmp.ne.s32.totalorder %s147_s14, %s441_s25  ;;  %s446_s26 = sshll.u32 %s527_s23, 4  ;;  %s447_s26 = int_to_ptr.vmem [resolvable:$false] %s446_s26 }
  0x3c   : > { %s448_s27 = scalar_lea.vmem %s447_s26, 256  ;;  %p449_p11 = scmp.lt.s32.totalorder %s147_s14, %s447_s26 }
  0x3d   : > { %p444_p9 = pnand %p442_p5, %p402_p3  ;;  %p450_p12 = scmp.lt.s32.totalorder %s448_s27, %s441_s25 }
  0x3f   : > { %p445_p0 = pneg %p444_p9  ;;  %p451_p6 = por %p450_p12, %p449_p11 }
  0x41   : > { %p452_p7 = pnand %p451_p6, %p445_p0 }
  0x43   : > { %455 = shalt.err (!%p452_p7)
}
  0x44   : > { %355 = dma.hbm_to_vmem [thread:$0]  (!%p620_p13), %s666_s7, 128, %s147_s14, %s136_s28  }
  0x45   : > { %p768_p1 = scmp.ne.s32.totalorder %s767_s29, 0 }
  0x46   : > { %s692_s5 = sand.u32 (!%p768_p1), 1, %s516_s10   ;;  %p769_p3 = scmp.ne.s32.totalorder (!%p768_p1), %s761_s20, 0 }
  0x47   : > { %155 = sbr.rel (%p768_p1) target bundleno = 120 (0x78), region = 28  ;;  %s336_s6 = sshll.u32 (!%p768_p1), %s692_s5, 3 }
  0x48   : > { %s158_s8 = scalar_lea.sflag (!%p768_p1), [#allocation3], %s692_s5  ;;  %s161_s30 = scalar_lea.vmem (!%p768_p1), [#allocation2], %s336_s6 }
  0x4c   : > { %499 = dma.done.wait (%p769_p3), %s158_s8, 128  }
  0x4d   : > { %501 = vsyncadd (%p769_p3), %s158_s8, 4294967168  ;;  %s167_s3 = scalar_lea.sflag [#allocation6], %s692_s5  ;;  %s170_s7 = scalar_lea.vmem [#allocation5], %s336_s6 }
  0x4e   : > { %503 = dma.done.wait (%p769_p3), %s167_s3, 128  }
  0x4f   : > { %505 = vsyncadd (%p769_p3), %s167_s3, 4294967168  ;;  %s341_s29 = smul.u32 24, %s692_s5  ;;  %v196_v0 = vld [vmem:[%s161_s30] sm:$0xff]  ;;  %v197_v1 = vld [vmem:[%s170_s7] sm:$0xff]  ;;  %s219_s24 = scalar_lea.sflag [#allocation4], %s692_s5 }
  0x50   : > { %396 = vlog2.f32 %v196_v0  ;;  %v201_v2 = vsub.f32 1.0, %v196_v0  ;;  %v210_v3 = vmul.f32 %v197_v1, %v196_v0  ;;  %v211_v4 = vadd.f32 %v197_v1, %v196_v0  ;;  %s342_s20 = smul.u32 384, %s567_s13  ;;  %p770_p13 = scmp.ne.s32.totalorder %s762_s21, 0 }
  0x51   : > { %s195_s14 = scalar_lea.vmem [#allocation7], %s341_s29  ;;  %v206_v10 = vsub.f32 1.0, %v197_v1  ;;  %s528_s13 = smov [#allocation7]  }
  0x52   : > { %398 = vlog2.f32 %v201_v2  ;;  %215 = vst [vmem:[%s195_s14 + $0x8] sm:$0xff] %v210_v3  ;;  %217 = vst [vmem:[%s195_s14 + $0x10] sm:$0xff] %v211_v4  ;;  %s232_s28 = sshll.u32 %s195_s14, 4  ;;  %s712_s17 = scalar_lea.hbm %s757_s2, %s342_s20  ;;  %s707_s28 = int_to_ptr.vmem [resolvable:$true] %s232_s28 }
  0x53   : > { %s456_s19 = scalar_lea.vmem %s707_s28, 384  ;;  %s460_s25 = sshll.u32 %s528_s13, 4  ;;  %s461_s25 = int_to_ptr.vmem [resolvable:$false] %s460_s25 }
  0x54   : > { %p457_p6 = scmp.ne.s32.totalorder %s707_s28, %s456_s19  ;;  %s462_s23 = scalar_lea.vmem %s461_s25, 768 }
  0x55   : > { %p463_p10 = scmp.lt.s32.totalorder %s707_s28, %s461_s25  ;;  %p464_p2 = scmp.lt.s32.totalorder %s462_s23, %s456_s19 }
  0x56   : > { %p458_p7 = pnand %p457_p6, %p770_p13 }
  0x57   : > { %p465_p4 = por %p464_p2, %p463_p10 }
  0x58   : > { %p459_p8 = pneg %p458_p7 }
  0x5a   : > { %p466_p5 = pnand %p465_p4, %p459_p8 }
  0x5d   : > { %v397_v5 = vpop.eup %396 }
  0x5e   : > { %v199_v6 = vmul.f32 0.6931472, %v397_v5 }
  0x5f   : > { %v399_v7 = vpop.eup %398 }
  0x60   : > { %v200_v8 = vmax.f32 %v199_v6, -100.0  ;;  %v203_v9 = vmul.f32 0.6931472, %v399_v7 }
  0x62   : > { %v204_v11 = vmax.f32 %v203_v9, -100.0  ;;  %v205_v12 = vmul.f32 %v200_v8, %v197_v1 }
  0x64   : > { %v207_v13 = vmul.f32 %v206_v10, %v204_v11 }
  0x66   : > { %v208_v14 = vadd.f32 %v207_v13, %v205_v12 }
  0x68   : > { %v209_v15 = vsub.f32 0.0, %v208_v14 }
  0x6a   : > { %213 = vst [vmem:[%s195_s14] sm:$0xff] %v209_v15 }
  0x6b   : > { %469 = shalt.err (!%p466_p5)
}
  0x6c   : > { %s470_s26 = scalar_lea.hbm %s712_s17, 384  ;;  %s474_s8 = scalar_lea.hbm %s757_s2, 768 }
  0x6d   : > { %p471_p9 = scmp.ne.s32.totalorder %s712_s17, %s470_s26  ;;  %p475_p12 = scmp.lt.s32.totalorder %s712_s17, %s757_s2 }
  0x6e   : > { %p476_p1 = scmp.lt.s32.totalorder %s474_s8, %s470_s26 }
  0x6f   : > { %p472_p0 = pnand %p471_p9, %p770_p13 }
  0x70   : > { %p477_p3 = por %p476_p1, %p475_p12 }
  0x71   : > { %p473_p11 = pneg %p472_p0 }
  0x73   : > { %p478_p6 = pnand %p477_p3, %p473_p11 }
  0x75   : > { %481 = shalt.err (!%p478_p6)
}
  0x76   : > { %s529_s7 = smov 128   ;;  %s530_s29 = smov 8  }
  0x77   : > { %347 = dma.vmem_to_hbm [thread:$0]  (%p770_p13), %s707_s28, 384, %s712_s17, %s219_s24, %s529_s7, %s529_s7, %s530_s29  }
  0x78 PF: > { %s247_s14 = sand.u32 1, %s512_s9   ;;  %p771_p7 = scmp.ne.s32.totalorder %s763_s22, 0 }
  0x79   : > { %p772_p8 = scmp.ge.s32.totalorder %s524_s12, 2  ;;  %s248_s20 = scalar_lea.sflag [#allocation4], %s247_s14 }
  0x7b   : > { %p357_p10 = pnand %p772_p8, %p771_p7 }
  0x7d   : > { %p358_p2 = pneg %p357_p10 }
  0x7f   : > { %507 = dma.done.wait (%p358_p2), %s248_s20, 384  }
  0x80   : > { %509 = vsyncadd (%p358_p2), %s248_s20, 4294966912  ;;  %p18_p4 = scmp.ge.s32.totalorder %s571_s15, 4   ;;  %s773_s9 = smov %s516_s10 }
  0x81   : > { %s774_s10 = smov %s520_s11  ;;  %s775_s11 = smov %s583_s18 }
  0x82   : > { %s776_s12 = smov %s571_s15  ;;  %20 = sbr.rel (!%p18_p4) target bundleno = 7 (0x7), region = 86 }
  0x87   :  { %253 = vsyncpa [#allocation3], 1 }
  0x88   :  { %255 = vsyncpa [#allocation3 + $0x1], 1 }
  0x89   :  { %256 = vsyncpa [#allocation6], 1 }
  0x8a   :  { %258 = vsyncpa [#allocation6 + $0x1], 1 }
  0x8b   :  { %259 = vsyncpa [#allocation4], 1 }
  0x8c   :  { %261 = vsyncpa [#allocation4 + $0x1], 1 }

</bundles_post_ra>
